<compile_context>
chip_gen: v6e
topology: v6e:2x2x1
jax: 0.10.0
libtpu: 0.0.40
codegen_flags: <defaults>
</compile_context>

<pallas_src>
import functools

import jax
import jax.numpy as jnp
import numpy as np
from jax import lax
from jax.experimental import pallas as pl
from jax.experimental.pallas import tpu as pltpu


def _wn_layer_kernel(off_ref, x_ref, w_in_ref, b_in_ref, w_rs_ref, b_rs_ref,
                     out_ref, x_scr,
                     *, hidden, ksize, max_pad, seq_len, n_layers,
                     compute_dtype):
    """One (batch b, layer l) grid step of the WN stack.

    off_ref  : (L, K) int32 SMEM   scalar-prefetched tap-start offsets
    x_ref    : (1, Tp, H)  f32     zero-padded input frame of batch b
    w_in_ref : (1, K*H, 2H)        layer-l im2col dilated-conv weight
    b_in_ref : (1, 1, 2H)  f32
    w_rs_ref : (1, H, 2H)          layer-l 1x1 res/skip weight (last layer padded)
    b_rs_ref : (1, 1, 2H)  f32
    out_ref  : (1, T, H)   f32     skip accumulator, VMEM-resident across l
    x_scr    : (Tp, H)     f32     running hidden state of batch b (VMEM)
    """
    H = hidden
    T = seq_len
    l = pl.program_id(1)

    @pl.when(l == 0)
    def _():
        # Fresh batch element: load the hidden state, zero the skip accumulator.
        x_scr[...] = x_ref[0]
        out_ref[...] = jnp.zeros_like(out_ref)

    # im2col: gather K dilated taps (dynamic, layer-dependent starts from SMEM)
    # and concatenate along lanes -> one deep (T, K*H) x (K*H, 2H) MXU dot.
    # Tap start = max_pad - pad_l + k*dil_l, so conv output row j corresponds
    # to frame row max_pad + j for every layer (aligned residual scatter).
    taps = []
    for k in range(ksize):
        start = off_ref[l, k]
        taps.append(x_scr[pl.ds(start, T), :].astype(compute_dtype))
    xi = jnp.concatenate(taps, axis=-1) if ksize > 1 else taps[0]

    pre = jnp.dot(xi, w_in_ref[0], preferred_element_type=jnp.float32)
    pre = pre + b_in_ref[0]                                     # (T, 2H) f32

    # Gated activation (f32 VPU/EUP).  Dropout(p=0) == identity.
    acts = jnp.tanh(pre[:, :H]) * jax.nn.sigmoid(pre[:, H:])

    # 1x1 res/skip conv.
    rs = jnp.dot(acts.astype(compute_dtype), w_rs_ref[0],
                 preferred_element_type=jnp.float32)
    rs = rs + b_rs_ref[0]                                       # (T, 2H) f32

    # Residual path (skipped on the last layer, whose residual half is zero).
    # Store start = max_pad is a multiple of 8 -> sublane-aligned.
    @pl.when(l < n_layers - 1)
    def _():
        x_scr[max_pad:max_pad + T, :] = x_scr[max_pad:max_pad + T, :] + rs[:, :H]

    # Skip path: accumulate into the VMEM-resident output block; it is written
    # back to HBM exactly once, when the batch index changes.
    out_ref[0] = out_ref[0] + rs[:, H:]


def make_wn_params(key, hidden, kernel_size, dilation_rate, n_layers):
    """Deterministic synthetic params; weight_norm resolved to effective weights."""
    params = []
    for i in range(n_layers):
        key, k1, k2, k3, k4, k5, k6 = jax.random.split(key, 7)
        c_rs = 2 * hidden if i < n_layers - 1 else hidden
        # in_layer: Conv1d(H, 2H, K, dilation) with weight_norm
        v_in = 0.1 * jax.random.normal(k1, (2 * hidden, hidden, kernel_size), jnp.float32)
        g_in = 0.5 + jnp.abs(jax.random.normal(k2, (2 * hidden, 1, 1), jnp.float32))
        w_in = g_in * v_in / jnp.sqrt(jnp.sum(v_in ** 2, axis=(1, 2), keepdims=True))
        b_in = 0.1 * jax.random.normal(k3, (2 * hidden,), jnp.float32)
        # res_skip_layer: Conv1d(H, c_rs, 1) with weight_norm
        v_rs = 0.1 * jax.random.normal(k4, (c_rs, hidden, 1), jnp.float32)
        g_rs = 0.5 + jnp.abs(jax.random.normal(k5, (c_rs, 1, 1), jnp.float32))
        w_rs = g_rs * v_rs / jnp.sqrt(jnp.sum(v_rs ** 2, axis=(1, 2), keepdims=True))
        b_rs = 0.1 * jax.random.normal(k6, (c_rs,), jnp.float32)
        params.append(dict(w_in=w_in, b_in=b_in, w_rs=w_rs, b_rs=b_rs))
    return params


def wn_forward_pallas(x_bct, params, kernel_size, dilation_rate, n_layers,
                      compute_dtype=jnp.float32):
    """x_bct: [B, C, T] (PyTorch NCL). Returns the output in the same layout."""
    B, H, T = x_bct.shape
    K = kernel_size
    L = n_layers
    assert K % 2 == 1, "odd kernel_size expected (matches PyTorch 'same' padding)"

    dils = [dilation_rate ** i for i in range(L)]
    pads = [((K - 1) * d) // 2 for d in dils]

    # Shared halo >= every layer's pad, rounded to 8 sublanes so the residual
    # store into x_scr (start = max_pad) is sublane-aligned.
    max_pad = ((max(pads) + 7) // 8) * 8
    Tp = T + 2 * max_pad

    # Channels-last, zero-padded ONCE per batch element.
    x = jnp.transpose(x_bct, (0, 2, 1)).astype(jnp.float32)           # (B, T, H)
    x_pad = jnp.pad(x, ((0, 0), (max_pad, max_pad), (0, 0)))          # (B, Tp, H)

    # Per-layer tap-start offsets (scalar prefetch): off[l, k] = max_pad - p_l + k*d_l.
    tap_off = np.zeros((L, K), np.int32)
    for l in range(L):
        for k in range(K):
            tap_off[l, k] = max_pad - pads[l] + k * dils[l]
    tap_off = jnp.asarray(tap_off)

    # Stack per-layer effective weights (weight_norm already folded in).
    w_in_list, b_in_list, w_rs_list, b_rs_list = [], [], [], []
    for i, p in enumerate(params):
        # im2col layout: row index = k*H + h  ->  W[k*H + h, o] = w_torch[o, h, k]
        w_in_t = jnp.transpose(p["w_in"], (2, 1, 0)).reshape(K * H, 2 * H)
        w_in_list.append(w_in_t)
        b_in_list.append(p["b_in"].reshape(1, 2 * H))
        w_rs = jnp.transpose(p["w_rs"][:, :, 0], (1, 0))              # (H, C_rs)
        b_rs = p["b_rs"]
        if i == L - 1:
            # Last layer: all H outputs are "skip"; zero-pad the residual half
            # so every layer has an identical (H, 2H) weight shape.
            w_rs = jnp.concatenate([jnp.zeros((H, H), w_rs.dtype), w_rs], axis=1)
            b_rs = jnp.concatenate([jnp.zeros((H,), b_rs.dtype), b_rs], axis=0)
        w_rs_list.append(w_rs)
        b_rs_list.append(b_rs.reshape(1, 2 * H))

    w_in = jnp.stack(w_in_list).astype(compute_dtype)                 # (L, K*H, 2H)
    b_in = jnp.stack(b_in_list).astype(jnp.float32)                   # (L, 1, 2H)
    w_rs = jnp.stack(w_rs_list).astype(compute_dtype)                 # (L, H, 2H)
    b_rs = jnp.stack(b_rs_list).astype(jnp.float32)                   # (L, 1, 2H)

    kernel = functools.partial(
        _wn_layer_kernel, hidden=H, ksize=K, max_pad=max_pad, seq_len=T,
        n_layers=L, compute_dtype=compute_dtype)

    grid_spec = pltpu.PrefetchScalarGridSpec(
        num_scalar_prefetch=1,
        grid=(B, L),
        in_specs=[
            pl.BlockSpec((1, Tp, H), lambda b, l, off: (b, 0, 0)),        # x (per-batch)
            pl.BlockSpec((1, K * H, 2 * H), lambda b, l, off: (l, 0, 0)),  # w_in (streamed)
            pl.BlockSpec((1, 1, 2 * H), lambda b, l, off: (l, 0, 0)),      # b_in
            pl.BlockSpec((1, H, 2 * H), lambda b, l, off: (l, 0, 0)),      # w_rs
            pl.BlockSpec((1, 1, 2 * H), lambda b, l, off: (l, 0, 0)),      # b_rs
        ],
        out_specs=pl.BlockSpec((1, T, H), lambda b, l, off: (b, 0, 0)),
        scratch_shapes=[pltpu.VMEM((Tp, H), jnp.float32)],
    )

    out = pl.pallas_call(
        kernel,
        grid_spec=grid_spec,
        out_shape=jax.ShapeDtypeStruct((B, T, H), jnp.float32),
        compiler_params=pltpu.CompilerParams(
            dimension_semantics=("parallel", "arbitrary"),
            vmem_limit_bytes=32 * 1024 * 1024),
    )(tap_off, x_pad, w_in, b_in, w_rs, b_rs)

    return jnp.transpose(out, (0, 2, 1))                              # -> [B, C, T]


def wn_forward_reference(x_bct, params, kernel_size, dilation_rate, n_layers):
    """Pure-JAX reference mirroring the PyTorch forward (NCL layout)."""
    x = x_bct.astype(jnp.float32)
    output = jnp.zeros_like(x)
    hidden = x.shape[1]
    for i, p in enumerate(params):
        dilation = dilation_rate ** i
        pad = (kernel_size * dilation - dilation) // 2
        x_in = lax.conv_general_dilated(
            x, p["w_in"], window_strides=(1,), padding=[(pad, pad)],
            rhs_dilation=(dilation,), dimension_numbers=("NCH", "OIH", "NCH"),
            precision=lax.Precision.HIGHEST) + p["b_in"][None, :, None]
        a, b = jnp.split(x_in, 2, axis=1)
        acts = jnp.tanh(a) * jax.nn.sigmoid(b)
        rs = lax.conv_general_dilated(
            acts, p["w_rs"], window_strides=(1,), padding=[(0, 0)],
            dimension_numbers=("NCH", "OIH", "NCH"),
            precision=lax.Precision.HIGHEST) + p["b_rs"][None, :, None]
        if i < n_layers - 1:
            x = x + rs[:, :hidden, :]
            output = output + rs[:, hidden:, :]
        else:
            output = output + rs
    return output


if __name__ == "__main__":
    # Module config (small, consistent with WN.__init__)
    hidden_channels = 32
    kernel_size = 3
    dilation_rate = 2
    n_layers = 3
    B, T = 2, 16

    key = jax.random.PRNGKey(0)
    key, kx, kp = jax.random.split(key, 3)
    x = jax.random.normal(kx, (B, hidden_channels, T), jnp.float32)   # NCL like PyTorch
    params = make_wn_params(kp, hidden_channels, kernel_size, dilation_rate, n_layers)

    out_ref = wn_forward_reference(x, params, kernel_size, dilation_rate, n_layers)

    # f32 MXU path.
    out_f32 = jax.block_until_ready(
        wn_forward_pallas(x, params, kernel_size, dilation_rate, n_layers,
                          compute_dtype=jnp.float32))
    np.testing.assert_allclose(np.asarray(out_f32), np.asarray(out_ref),
                               rtol=1e-2, atol=1e-2)

    # bf16 MXU operands (f32 accumulation / gating / residuals) -- the v6e/v7x
    # production configuration; looser tolerance accounts for bf16 operands.
    out_bf16 = jax.block_until_ready(
        wn_forward_pallas(x, params, kernel_size, dilation_rate, n_layers,
                          compute_dtype=jnp.bfloat16))
    np.testing.assert_allclose(np.asarray(out_bf16), np.asarray(out_ref),
                               rtol=5e-2, atol=5e-2)

    print("KERNEL_OK")
</pallas_src>

<mosaic_0001>
module attributes {stable_mosaic.version = 11 : i64} {
  func.func @_wn_layer_kernel(%arg0: i32, %arg1: i32, %arg2: memref<3x3xi32, #tpu.memory_space<smem>>, %arg3: memref<1x32x32xf32, #tpu.memory_space<vmem>>, %arg4: memref<1x96x64xf32, #tpu.memory_space<vmem>>, %arg5: memref<1x1x64xf32, #tpu.memory_space<vmem>>, %arg6: memref<1x32x64xf32, #tpu.memory_space<vmem>>, %arg7: memref<1x1x64xf32, #tpu.memory_space<vmem>>, %arg8: memref<1x16x32xf32, #tpu.memory_space<vmem>>, %arg9: memref<32x32xf32, #tpu.memory_space<vmem>>) attributes {dimension_semantics = [#tpu.dimension_semantics<parallel>, #tpu.dimension_semantics<arbitrary>], iteration_bounds = array<i64: 2, 3>, scalar_prefetch = 1 : i64, scratch_operands = 1 : i64, tpu.core_type = #tpu.core_type<tc>, window_params = [{transform_indices = @transform_0, window_bounds = array<i64: 1, 32, 32>}, {transform_indices = @transform_1, window_bounds = array<i64: 1, 96, 64>}, {transform_indices = @transform_2, window_bounds = array<i64: 1, 1, 64>}, {transform_indices = @transform_3, window_bounds = array<i64: 1, 32, 64>}, {transform_indices = @transform_4, window_bounds = array<i64: 1, 1, 64>}, {transform_indices = @transform_5, window_bounds = array<i64: 1, 16, 32>}]} {
    %c0_i32 = arith.constant 0 : i32
    %0 = arith.cmpi eq, %arg1, %c0_i32 : i32
    %1 = arith.extui %0 : i1 to i32
    %c0_i32_0 = arith.constant 0 : i32
    %2 = arith.cmpi ne, %1, %c0_i32_0 : i32
    scf.if %2 {
      %c0_25 = arith.constant 0 : index
      %c0_26 = arith.constant 0 : index
      %c0_27 = arith.constant 0 : index
      %49 = vector.load %arg3[%c0_25, %c0_26, %c0_27] : memref<1x32x32xf32, #tpu.memory_space<vmem>>, vector<1x32x32xf32>
      %50 = vector.shape_cast %49 : vector<1x32x32xf32> to vector<32x32xf32>
      %c0_28 = arith.constant 0 : index
      %c0_29 = arith.constant 0 : index
      %51 = vector.load %arg9[%c0_28, %c0_29] : memref<32x32xf32, #tpu.memory_space<vmem>>, vector<32x32xf32>
      tpu.vector_store %arg9[%c0_28, %c0_29], %50 {strides = array<i32>} : memref<32x32xf32, #tpu.memory_space<vmem>>, vector<32x32xf32>,
      %cst_30 = arith.constant 0.000000e+00 : f32
      %52 = vector.broadcast %cst_30 : f32 to vector<1x16x32xf32>
      %c0_31 = arith.constant 0 : index
      %c0_32 = arith.constant 0 : index
      %c0_33 = arith.constant 0 : index
      %53 = vector.load %arg8[%c0_31, %c0_32, %c0_33] : memref<1x16x32xf32, #tpu.memory_space<vmem>>, vector<1x16x32xf32>
      tpu.vector_store %arg8[%c0_31, %c0_32, %c0_33], %52 {strides = array<i32>} : memref<1x16x32xf32, #tpu.memory_space<vmem>>, vector<1x16x32xf32>,
    } else {
    }
    %3 = arith.index_cast %arg1 : i32 to index
    %c0 = arith.constant 0 : index
    %4 = memref.load %arg2[%3, %c0] : memref<3x3xi32, #tpu.memory_space<smem>>
    %5 = arith.index_cast %4 : i32 to index
    %c0_1 = arith.constant 0 : index
    %6 = vector.load %arg9[%5, %c0_1] : memref<32x32xf32, #tpu.memory_space<vmem>>, vector<16x32xf32>
    %7 = arith.index_cast %arg1 : i32 to index
    %c1 = arith.constant 1 : index
    %8 = memref.load %arg2[%7, %c1] : memref<3x3xi32, #tpu.memory_space<smem>>
    %9 = arith.index_cast %8 : i32 to index
    %c0_2 = arith.constant 0 : index
    %10 = vector.load %arg9[%9, %c0_2] : memref<32x32xf32, #tpu.memory_space<vmem>>, vector<16x32xf32>
    %11 = arith.index_cast %arg1 : i32 to index
    %c2 = arith.constant 2 : index
    %12 = memref.load %arg2[%11, %c2] : memref<3x3xi32, #tpu.memory_space<smem>>
    %13 = arith.index_cast %12 : i32 to index
    %c0_3 = arith.constant 0 : index
    %14 = vector.load %arg9[%13, %c0_3] : memref<32x32xf32, #tpu.memory_space<vmem>>, vector<16x32xf32>
    %15 = tpu.concatenate %6, %10, %14 in 1 : vector<16x32xf32>, vector<16x32xf32>, vector<16x32xf32> -> vector<16x96xf32>
    %c0_4 = arith.constant 0 : index
    %c0_5 = arith.constant 0 : index
    %c0_6 = arith.constant 0 : index
    %16 = vector.load %arg4[%c0_4, %c0_5, %c0_6] : memref<1x96x64xf32, #tpu.memory_space<vmem>>, vector<1x96x64xf32>
    %17 = vector.shape_cast %16 : vector<1x96x64xf32> to vector<96x64xf32>
    %cst = arith.constant dense<0.000000e+00> : vector<16x64xf32>
    %18 = tpu.matmul %15, %17, %cst {dimension_numbers = #tpu.dot_dimension_numbers<[1], [0], [0], [1], [0, 0, 1, 1], [], []>} : vector<16x96xf32>, vector<96x64xf32>, vector<16x64xf32> -> vector<16x64xf32>
    %c0_7 = arith.constant 0 : index
    %c0_8 = arith.constant 0 : index
    %c0_9 = arith.constant 0 : index
    %19 = vector.load %arg5[%c0_7, %c0_8, %c0_9] : memref<1x1x64xf32, #tpu.memory_space<vmem>>, vector<1x1x64xf32>
    %20 = vector.shape_cast %19 : vector<1x1x64xf32> to vector<1x64xf32>
    %21 = vector.broadcast %20 : vector<1x64xf32> to vector<16x64xf32>
    %22 = arith.addf %18, %21 : vector<16x64xf32>
    %23 = vector.extract_strided_slice %22 {offsets = [0, 0], sizes = [16, 32], strides = [1, 1]} : vector<16x64xf32> to vector<16x32xf32>
    %24 = math.tanh %23 : vector<16x32xf32>
    %25 = vector.extract_strided_slice %22 {offsets = [0, 32], sizes = [16, 32], strides = [1, 1]} : vector<16x64xf32> to vector<16x32xf32>
    %26 = arith.negf %25 : vector<16x32xf32>
    %27 = math.exp %26 : vector<16x32xf32>
    %cst_10 = arith.constant 1.000000e+00 : f32
    %28 = vector.broadcast %cst_10 : f32 to vector<16x32xf32>
    %29 = arith.addf %28, %27 : vector<16x32xf32>
    %30 = arith.divf %28, %29 : vector<16x32xf32>
    %31 = arith.mulf %24, %30 : vector<16x32xf32>
    %c0_11 = arith.constant 0 : index
    %c0_12 = arith.constant 0 : index
    %c0_13 = arith.constant 0 : index
    %32 = vector.load %arg6[%c0_11, %c0_12, %c0_13] : memref<1x32x64xf32, #tpu.memory_space<vmem>>, vector<1x32x64xf32>
    %33 = vector.shape_cast %32 : vector<1x32x64xf32> to vector<32x64xf32>
    %cst_14 = arith.constant dense<0.000000e+00> : vector<16x64xf32>
    %34 = tpu.matmul %31, %33, %cst_14 {dimension_numbers = #tpu.dot_dimension_numbers<[1], [0], [0], [1], [0, 0, 1, 1], [], []>} : vector<16x32xf32>, vector<32x64xf32>, vector<16x64xf32> -> vector<16x64xf32>
    %c0_15 = arith.constant 0 : index
    %c0_16 = arith.constant 0 : index
    %c0_17 = arith.constant 0 : index
    %35 = vector.load %arg7[%c0_15, %c0_16, %c0_17] : memref<1x1x64xf32, #tpu.memory_space<vmem>>, vector<1x1x64xf32>
    %36 = vector.shape_cast %35 : vector<1x1x64xf32> to vector<1x64xf32>
    %37 = vector.broadcast %36 : vector<1x64xf32> to vector<16x64xf32>
    %38 = arith.addf %34, %37 : vector<16x64xf32>
    %c2_i32 = arith.constant 2 : i32
    %39 = arith.cmpi slt, %arg1, %c2_i32 : i32
    %40 = arith.extui %39 : i1 to i32
    %c0_i32_18 = arith.constant 0 : i32
    %41 = arith.cmpi ne, %40, %c0_i32_18 : i32
    scf.if %41 {
      %c8 = arith.constant 8 : index
      %c0_25 = arith.constant 0 : index
      %49 = vector.load %arg9[%c8, %c0_25] : memref<32x32xf32, #tpu.memory_space<vmem>>, vector<16x32xf32>
      %50 = vector.extract_strided_slice %38 {offsets = [0, 0], sizes = [16, 32], strides = [1, 1]} : vector<16x64xf32> to vector<16x32xf32>
      %51 = arith.addf %49, %50 : vector<16x32xf32>
      %c8_26 = arith.constant 8 : index
      %c0_27 = arith.constant 0 : index
      %52 = vector.load %arg9[%c8_26, %c0_27] : memref<32x32xf32, #tpu.memory_space<vmem>>, vector<16x32xf32>
      tpu.vector_store %arg9[%c8_26, %c0_27], %51 {strides = array<i32>} : memref<32x32xf32, #tpu.memory_space<vmem>>, vector<16x32xf32>,
    } else {
    }
    %c0_19 = arith.constant 0 : index
    %c0_20 = arith.constant 0 : index
    %c0_21 = arith.constant 0 : index
    %42 = vector.load %arg8[%c0_19, %c0_20, %c0_21] : memref<1x16x32xf32, #tpu.memory_space<vmem>>, vector<1x16x32xf32>
    %43 = vector.shape_cast %42 : vector<1x16x32xf32> to vector<16x32xf32>
    %44 = vector.extract_strided_slice %38 {offsets = [0, 32], sizes = [16, 32], strides = [1, 1]} : vector<16x64xf32> to vector<16x32xf32>
    %45 = arith.addf %43, %44 : vector<16x32xf32>
    %c0_22 = arith.constant 0 : index
    %c0_23 = arith.constant 0 : index
    %c0_24 = arith.constant 0 : index
    %46 = vector.load %arg8[%c0_22, %c0_23, %c0_24] : memref<1x16x32xf32, #tpu.memory_space<vmem>>, vector<1x16x32xf32>
    %47 = vector.shape_cast %46 : vector<1x16x32xf32> to vector<16x32xf32>
    %48 = vector.shape_cast %45 : vector<16x32xf32> to vector<1x16x32xf32>
    tpu.vector_store %arg8[%c0_22, %c0_23, %c0_24], %48 {strides = array<i32>} : memref<1x16x32xf32, #tpu.memory_space<vmem>>, vector<1x16x32xf32>,
    return
  }
  func.func @transform_0(%arg0: i32, %arg1: i32, %arg2: memref<3x3xi32, #tpu.memory_space<smem>>) -> (i32, i32, i32) {
    %c0_i32 = arith.constant 0 : i32
    %c0_i32_0 = arith.constant 0 : i32
    %c0_i32_1 = arith.constant 0 : i32
    return %arg0, %c0_i32, %c0_i32_0 : i32, i32, i32
  }
  func.func @transform_1(%arg0: i32, %arg1: i32, %arg2: memref<3x3xi32, #tpu.memory_space<smem>>) -> (i32, i32, i32) {
    %c0_i32 = arith.constant 0 : i32
    %c0_i32_0 = arith.constant 0 : i32
    %c0_i32_1 = arith.constant 0 : i32
    return %arg1, %c0_i32, %c0_i32_0 : i32, i32, i32
  }
  func.func @transform_2(%arg0: i32, %arg1: i32, %arg2: memref<3x3xi32, #tpu.memory_space<smem>>) -> (i32, i32, i32) {
    %c0_i32 = arith.constant 0 : i32
    %c0_i32_0 = arith.constant 0 : i32
    %c0_i32_1 = arith.constant 0 : i32
    return %arg1, %c0_i32, %c0_i32_0 : i32, i32, i32
  }
  func.func @transform_3(%arg0: i32, %arg1: i32, %arg2: memref<3x3xi32, #tpu.memory_space<smem>>) -> (i32, i32, i32) {
    %c0_i32 = arith.constant 0 : i32
    %c0_i32_0 = arith.constant 0 : i32
    %c0_i32_1 = arith.constant 0 : i32
    return %arg1, %c0_i32, %c0_i32_0 : i32, i32, i32
  }
  func.func @transform_4(%arg0: i32, %arg1: i32, %arg2: memref<3x3xi32, #tpu.memory_space<smem>>) -> (i32, i32, i32) {
    %c0_i32 = arith.constant 0 : i32
    %c0_i32_0 = arith.constant 0 : i32
    %c0_i32_1 = arith.constant 0 : i32
    return %arg1, %c0_i32, %c0_i32_0 : i32, i32, i32
  }
  func.func @transform_5(%arg0: i32, %arg1: i32, %arg2: memref<3x3xi32, #tpu.memory_space<smem>>) -> (i32, i32, i32) {
    %c0_i32 = arith.constant 0 : i32
    %c0_i32_0 = arith.constant 0 : i32
    %c0_i32_1 = arith.constant 0 : i32
    return %arg0, %c0_i32, %c0_i32_0 : i32, i32, i32
  }
}

</mosaic_0001>

<bundles_post_ra>
// kernel: tpu_custom_call.1
= control target key start
LH: loop header
LB: loop body
LE: loop exit
PB: predicated region body
PF: predicated region fallthrough
CT: control target
= control target key end

     0   :  { %s1281_s0 = inlined_call_operand.vmem [shape: s32[3,3], index: 0, kind: input, shape index: {}]   ;;  %s1282_s1 = inlined_call_operand.vmem [shape: f32[2,32,32], index: 1, kind: input, shape index: {}]   ;;  %s1283_s2 = inlined_call_operand.vmem [shape: f32[3,96,64], index: 2, kind: input, shape index: {}]   ;;  %s1284_s3 = inlined_call_operand.vmem [shape: f32[3,1,64], index: 3, kind: input, shape index: {}]   ;;  %s1285_s4 = inlined_call_operand.vmem [shape: f32[3,32,64], index: 4, kind: input, shape index: {}]   ;;  %s1286_s5 = inlined_call_operand.vmem [shape: f32[3,1,64], index: 5, kind: input, shape index: {}]   ;;  %s1287_s6 = inlined_call_operand.hbm [shape: f32[2,16,32], index: 6, kind: output, shape index: {}]  }
   0x1   :  { %s11_s23 = sshll.u32 %s1281_s0, 4  ;;  %s12_s23 = int_to_ptr.vmem [resolvable:$true] %s11_s23 }
   0x2   :  { %s914_s24 = scalar_lea.vmem %s12_s23, 64  ;;  %p919_p1 = scmp.lt.s32.totalorder %s12_s23, %s12_s23 }
   0x3   :  { %p915_p0 = scmp.ne.s32.totalorder %s12_s23, %s914_s24  ;;  %p920_p2 = scmp.lt.s32.totalorder %s914_s24, %s914_s24 }
   0x5   :  { %p921_p3 = por %p920_p2, %p919_p1 }
   0x7   :  { %p922_p4 = pnand %p921_p3, %p915_p0 }
   0x9   :  { %925 = shalt.err (!%p922_p4)  }
   0xa   :  { %s1022_s25 = smov [#allocation4]  }
   0xb   :  { %14 = dma.vmem_to_smem %s12_s23, 64, %s1022_s25, [#allocation3] }
   0xc   :  { %984 = dma.done.wait [#allocation3], 64 }
   0xd   :  { %985 = vsyncadd [#allocation3], 4294967232 }
   0xe   :  { %16 = sfence }
   0xf   :  { %17 = vsyncpa [#allocation6], 0 }
  0x10   :  { %19 = vsyncpa [#allocation6 + $0x1], 0  ;;  %s1068_s26 = smov 0   ;;  %s1070_s27 = smov 0  }
  0x11   :  { %s1072_s0 = smov 0   ;;  %s1074_s28 = smov 0  }
  0x12   :  { %s1076_s29 = smov 0   ;;  %s1078_s30 = smov 0  }
  0x13   :  { %s1080_s7 = smov 0   ;;  %s1082_s8 = smov 0  }
  0x14 LB: > { %1294 = sst [smem:[#allocation9_spill]] %s1000_s0  ;;  %s735_s9 = sadd.s32 4294967295, %s1020_s8   ;;  %s1020_s8 = sphi %s1082_s8, %s25_s8   ;;  %s1016_s7 = sphi %s1080_s7, %s1310_s7   ;;  %s1012_s30 = sphi %s1078_s30, %s1309_s30   ;;  %s1008_s29 = sphi %s1076_s29, %s1308_s29   ;;  %s1004_s28 = sphi %s1074_s28, %s1307_s28   ;;  %s1000_s0 = sphi %s1072_s0, %s1306_s0   ;;  %s996_s27 = sphi %s1070_s27, %s1312_s27   ;;  %s992_s26 = sphi %s1068_s26, %s1311_s26  }
  0x15   : > { %1295 = sst [smem:[#allocation10_spill]] %s1012_s30  ;;  %s736_s10 = sadd.s32 4294967294, %s1020_s8  }
  0x16   : > { %1296 = sst [smem:[#allocation11_spill]] %s1016_s7  ;;  %s34_s11 = sadd.s32 1, %s1012_s30 }
  0x17   : > { %p35_p5 = scmp.ge.s32.totalorder %s34_s11, 3  ;;  %s37_s12 = sadd.s32 1, %s1016_s7 }
  0x18   : > { %p184_p6 = scmp.ne.s32.totalorder %s1000_s0, %s996_s27  ;;  %p185_p7 = scmp.eq.s32.totalorder %s735_s9, 5 }
  0x19   : > { %s1314_s11 = smov (%p35_p5, %s34_s11), 0  ;;  %s1316_s12 = smov (!%p35_p5, %s37_s12), %s1016_s7 }
  0x1a   : > { %1297 = sst [smem:[#allocation12_spill]] %s1314_s11  ;;  %p1117_p8 = por %p185_p7, %p184_p6 }
  0x1b   : > { %p190_p9 = scmp.ne.s32.totalorder %s996_s27, %s992_s26  ;;  %p39_p10 = scmp.ge.s32.totalorder %s1316_s12, 2 }
  0x1c   : > { %p191_p11 = scmp.eq.s32.totalorder %s736_s10, 5  ;;  %p739_p12 = scmp.ge.s32.totalorder %s1020_s8, 1 }
  0x1d   : > { %p245_p13 = scmp.lt.s32.totalorder %s1020_s8, 7  ;;  %s1318_s12 = smov (%p39_p10, %s1316_s12), 0 }
  0x1e   : > { %1299 = sst [smem:[#allocation13_spill]] %s1318_s12  ;;  %p1127_p0 = por %p191_p11, %p190_p9 }
  0x1f   : > { %p246_p1 = pnand %p739_p12, %p245_p13  ;;  %s171_s15 = ssub.s32 %s1016_s7, %s1318_s12 }
  0x20   : > { %s1300_s14 = scalar_select %p1127_p0, 1, 0 }
  0x21   : > { %s174_s16 = sadd.s32 1, %s1000_s0  ;;  %p172_p2 = scmp.eq.s32.totalorder %s171_s15, 0 }
  0x22   : > { %1301 = sst [smem:[#allocation14_spill]] %s1300_s14  ;;  %249 = sbr.rel (%p246_p1) target bundleno = 867 (0x363), region = 40 }
  0x23   : > { %s1135_s17 = scalar_select %p172_p2, %s1000_s0, %s174_s16  }
  0x24   : > { %s1289_s18 = sand.u32 (!%p246_p1), 1, %s996_s27   ;;  %p289_p3 = scmp.lt.s32.totalorder (!%p246_p1), %s1008_s29, 1 }
  0x25   : > { %1302 = sst [smem:[#allocation15_spill]] %s1135_s17  ;;  %s740_s19 = sshll.u32 (!%p246_p1), %s1289_s18, 4 }
  0x26   : > { %p294_p4 = scmp.lt.s32.totalorder (!%p246_p1), %s1004_s28, 2  ;;  %s1169_s23 = scalar_lea.vmem (!%p246_p1), [#allocation5], %s740_s19 }
  0x27   : > { %s290_s20 = scalar_select %p289_p3, %s1008_s29, 1 }
  0x28   : > { %s1144_s21 = scalar_select %p294_p4, %s1004_s28, 2 }
  0x29   : > { %s762_s22 = sshll.u32 %s290_s20, 5  ;;  %p746_p5 = scmp.ne.s32.totalorder %s1004_s28, 0 }
  0x2a   : > { %s293_s25 = scalar_lea.vmem %s1282_s1, %s762_s22  ;;  %s823_s9 = smul.u32 96, %s1144_s21 }
  0x2b   : > { %s301_s16 = scalar_lea.vmem %s1284_s3, %s1144_s21  ;;  %s763_s12 = sshll.u32 %s1144_s21, 5 }
  0x2c   : > { %s1158_s7 = scalar_lea.vmem %s1283_s2, %s823_s9  ;;  %s1163_s0 = scalar_lea.vmem %s1285_s4, %s763_s12 }
  0x2d   : > { %s309_s22 = scalar_lea.vmem %s1286_s5, %s1144_s21  ;;  %313 = sbr.rel (%p746_p5) target bundleno = 54 (0x36), region = 44 }
  0x32   : > { %v314_v0 = vld [vmem:[%s293_s25] sm:$0xff]  ;;  %vm318_vm0 = vcmask 261120   ;;  %v315_v1 = vld [vmem:[%s293_s25 + $0x8] sm:$0xff]  ;;  %v316_v2 = vld [vmem:[%s293_s25 + $0x10] sm:$0xff]  ;;  %v1023_v4 = vmov 0.0  }
  0x33   : > { %319 = vst.msk [vmem:[#allocation2] sm:$0xff] %vm318_vm0, %v314_v0  ;;  %320 = vst.msk [vmem:[#allocation2 + $0x8] sm:$0xff] %vm318_vm0, %v315_v1  ;;  %v317_v3 = vld [vmem:[%s293_s25 + $0x18] sm:$0xff] }
  0x34   : > { %321 = vst.msk [vmem:[#allocation2 + $0x10] sm:$0xff] %vm318_vm0, %v316_v2  ;;  %323 = vst.msk [vmem:[%s1169_s23] sm:$0xff] %vm318_vm0, %v1023_v4 }
  0x35   : > { %324 = vst.msk [vmem:[%s1169_s23 + $0x8] sm:$0xff] %vm318_vm0, %v1023_v4  ;;  %322 = vst.msk [vmem:[#allocation2 + $0x18] sm:$0xff] %vm318_vm0, %v317_v3 }
  0x36 PF: > { %s1175_s30 = sshll.u32 %s1004_s28, 7  ;;  %v373_v5 = vld [vmem:[%s1158_s7 + $0x58] sm:$0xff]  ;;  %v372_v6 = vld [vmem:[%s1158_s7 + $0x50] sm:$0xff]  ;;  %v371_v7 = vld [vmem:[%s1158_s7 + $0x48] sm:$0xff]  ;;  %s1024_s19 = smov 32   ;;  %vm356_vm1 = vcmask 261120  }
  0x37   : > { %s330_s11 = sadd.s32 1, %s1175_s30  ;;  %s335_s12 = sadd.s32 2, %s1175_s30  ;;  %785 = vmatprep.subr.mxu0 %v373_v5  ;;  %v370_v8 = vld [vmem:[%s1158_s7 + $0x40] sm:$0xff]  ;;  %v369_v9 = vld [vmem:[%s1158_s7 + $0x38] sm:$0xff]  ;;  %v368_v10 = vld [vmem:[%s1158_s7 + $0x30] sm:$0xff]  ;;  %vm359_vm2 = vcmask 523264  }
  0x38   : > { %s331_s14 = sld [smem:[#allocation4 + %s330_s11]]  ;;  %786 = vmatpush3.msra.mxu0 %v373_v5  ;;  %v367_v13 = vld [vmem:[%s1158_s7 + $0x28] sm:$0xff]  ;;  %s1025_s25 = smov 64   ;;  %v366_v16 = vld [vmem:[%s1158_s7 + $0x20] sm:$0xff]  ;;  %v365_v17 = vld [vmem:[%s1158_s7 + $0x18] sm:$0xff]  ;;  %vm381_vm3 = vcmask 785408  }
  0x39   : > { %s336_s17 = sld [smem:[#allocation4 + %s335_s12]]  ;;  %787 = vmatprep.subr.mxu0 %v372_v6  ;;  %v364_v18 = vld [vmem:[%s1158_s7 + $0x10] sm:$0xff]  ;;  %v363_v19 = vld [vmem:[%s1158_s7 + $0x8] sm:$0xff]  ;;  %v362_v20 = vld [vmem:[%s1158_s7] sm:$0xff]  ;;  %p756_p6 = scmp.ge.s32.totalorder %s1004_s28, 2 }
  0x3a   : > { %788 = vmatpush3.msra.mxu0 %v372_v6  ;;  %s326_s9 = sld [smem:[#allocation4 + %s1175_s30]]  ;;  %v490_v31 = vld [vmem:[%s1163_s0 + $0x18] sm:$0xff]  ;;  %v489_v32 = vld [vmem:[%s1163_s0 + $0x10] sm:$0xff]  ;;  %v748_v33 = vld [vmem:[%s301_s16] ss:$0 sm:$0xff]  ;;  %s1026_s16 = smov 96  }
  0x3b   : > { %789 = vmatprep.subr.mxu0 %v371_v7  ;;  %812 = vmatprep.subr.mxu1 %v490_v31  ;;  %v488_v44 = vld [vmem:[%s1163_s0 + $0x8] sm:$0xff]  ;;  %v487_v45 = vld [vmem:[%s1163_s0] sm:$0xff] }
  0x3c   : > { %790 = vmatpush3.msra.mxu0 %v371_v7  ;;  %813 = vmatpush3.msra.mxu1 %v490_v31  ;;  %v753_v54 = vld [vmem:[%s309_s22] ss:$0 sm:$0xff] }
  0x3d   : > { %791 = vmatprep.subr.mxu0 %v370_v8  ;;  %814 = vmatprep.subr.mxu1 %v489_v32 }
  0x3e   : > { %792 = vmatpush3.msra.mxu0 %v370_v8  ;;  %s332_s18 = scalar_lea.vmem [#allocation2], %s331_s14  ;;  %815 = vmatpush3.msra.mxu1 %v489_v32 }
  0x3f   : > { %v333_v11 = vld [vmem:[%s332_s18] sm:$0xff]  ;;  %793 = vmatprep.subr.mxu0 %v369_v9  ;;  %s337_s24 = scalar_lea.vmem [#allocation2], %s336_s17  ;;  %v334_v14 = vld [vmem:[%s332_s18 + $0x8] sm:$0xff]  ;;  %816 = vmatprep.subr.mxu1 %v488_v44 }
  0x40   : > { %342 = vrot.lane.b32.xlu0 %v333_v11, %s1024_s19  ;;  %v338_v12 = vld [vmem:[%s337_s24] sm:$0xff]  ;;  %794 = vmatpush3.msra.mxu0 %v369_v9  ;;  %v339_v15 = vld [vmem:[%s337_s24 + $0x8] sm:$0xff]  ;;  %s327_s10 = scalar_lea.vmem [#allocation2], %s326_s9 }
  0x41   : > { %350 = vrot.lane.b32.xlu1 %v338_v12, %s1025_s25  ;;  %795 = vmatprep.subr.mxu0 %v368_v10  ;;  %v328_v21 = vld [vmem:[%s327_s10] sm:$0xff]  ;;  %v329_v26 = vld [vmem:[%s327_s10 + $0x8] sm:$0xff] }
  0x42   : > { %796 = vmatpush3.msra.mxu0 %v368_v10  ;;  %817 = vmatpush3.msra.mxu1 %v488_v44 }
  0x43   : > { %797 = vmatprep.subr.mxu0 %v367_v13  ;;  %818 = vmatprep.subr.mxu1 %v487_v45 }
  0x44   : > { %344 = vrot.lane.b32.xlu0 %v334_v14, %s1024_s19  ;;  %798 = vmatpush3.msra.mxu0 %v367_v13 }
  0x45   : > { %352 = vrot.lane.b32.xlu1 %v339_v15, %s1025_s25  ;;  %799 = vmatprep.subr.mxu0 %v366_v16 }
  0x46   : > { %800 = vmatpush3.msra.mxu0 %v366_v16  ;;  %819 = vmatpush3.msra.mxu1 %v487_v45 }
  0x47   : > { %801 = vmatprep.subr.mxu0 %v365_v17 }
  0x48   : > { %802 = vmatpush3.msra.mxu0 %v365_v17 }
  0x49   : > { %803 = vmatprep.subr.mxu0 %v364_v18 }
  0x4a   : > { %804 = vmatpush3.msra.mxu0 %v364_v18 }
  0x4b   : > { %805 = vmatprep.subr.mxu0 %v363_v19 }
  0x4c   : > { %806 = vmatpush3.msra.mxu0 %v363_v19 }
  0x4d   : > { %807 = vmatprep.subr.mxu0 %v362_v20 }
  0x4e   : > { %808 = vmatpush3.msra.mxu0 %v362_v20 }
  0xb2   : > { %v343_v22 = vpop.permute.xlu0 %342 }
  0xb3   : > { %v357_v23 = vsel %vm356_vm1, %v328_v21, %v343_v22  ;;  %v351_v24 = vpop.permute.xlu1 %350 }
  0xb4   : > { %v360_v25 = vsel %vm359_vm2, %v357_v23, %v351_v24 }
  0xb5   : > { %809 = vmatprep.mubr.msk.f32.mxu0 %vm381_vm3, %v360_v25 }
  0xb6   : > { %v345_v27 = vpop.permute.xlu0 %344 }
  0xb7   : > { %v358_v28 = vsel %vm356_vm1, %v329_v26, %v345_v27  ;;  %v353_v29 = vpop.permute.xlu1 %352 }
  0xb8   : > { %v361_v30 = vsel %vm359_vm2, %v358_v28, %v353_v29 }
  0xb9   : > { %810 = vmatmul.mubr.msk.f32.vlgmr.msra.gmra.mxu0 %vm381_vm3, %v361_v30 }
 0x179   : > { %v811_v34 = vpop.f32.mrf.mxu0 }
 0x17a   : > { %v460_v35 = vadd.f32 %v811_v34, %v748_v33 }
 0x17b   : > { %v454_v36 = vpop.f32.mrf.mxu0 }
 0x17c   : > { %v752_v37 = vmul.f32 -1.442695, %v460_v35  ;;  %v455_v38 = vadd.f32 %v748_v33, %v454_v36 }
 0x17e   : > { %902 = vpow2.f32 %v752_v37  ;;  %v751_v39 = vmul.f32 -1.442695, %v455_v38 }
 0x180   : > { %904 = vpow2.f32 %v751_v39 }
 0x18b   : > { %v903_v40 = vpop.eup %902 }
 0x18c   : > { %v472_v41 = vadd.f32 1.0, %v903_v40 }
 0x18d   : > { %v905_v42 = vpop.eup %904 }
 0x18e   : > { %906 = vrcp.f32 %v472_v41  ;;  %v471_v43 = vadd.f32 1.0, %v905_v42 }
 0x190   : > { %908 = vrcp.f32 %v471_v43 }
 0x191   : > { %910 = vtanh.f32 %v455_v38 }
 0x192   : > { %912 = vtanh.f32 %v460_v35 }
 0x19b   : > { %v907_v46 = vpop.eup %906 }
 0x19c   : > { %481 = vrot.lane.b32.xlu1 %v907_v46, %s1026_s16 }
 0x19d   : > { %v909_v47 = vpop.eup %908 }
 0x19e   : > { %479 = vrot.lane.b32.xlu0 %v909_v47, %s1026_s16  ;;  %v911_v49 = vpop.eup %910 }
 0x19f   : > { %v913_v51 = vpop.eup %912 }
 0x20e   : > { %v482_v48 = vpop.permute.xlu1 %481 }
 0x20f   : > { %v486_v53 = vmul.f32 %v913_v51, %v482_v48 }
 0x210   : > { %v480_v50 = vpop.permute.xlu0 %479 }
 0x211   : > { %v485_v52 = vmul.f32 %v911_v49, %v480_v50 }
 0x213   : > { %820 = vmatprep.mubr.msk.f32.mxu1 %vm356_vm1, %v485_v52 }
 0x214   : > { %821 = vmatmul.mubr.msk.f32.vlgmr.msra.gmra.mxu1 %vm356_vm1, %v486_v53 }
 0x2d3   : > { %582 = sbr.rel (%p756_p6) target bundleno = 732 (0x2dc), region = 48 }
 0x2d4   : > { %v822_v55 = vpop.f32.mrf.mxu1 }
 0x2d5   : > { %v576_v56 = vadd.f32 %v822_v55, %v753_v54 }
 0x2d6   : > { %v570_v57 = vpop.f32.mrf.mxu1 }
 0x2d7   : > { %v571_v58 = vadd.f32 %v753_v54, %v570_v57 }
 0x2d8   : > { %v583_v59 = vld [vmem:[#allocation2 + $0x8] sm:$0xff]  ;;  %v584_v60 = vld [vmem:[#allocation2 + $0x10] sm:$0xff] }
 0x2d9   : > { %v585_v61 = vadd.f32 %v583_v59, %v571_v58  ;;  %v586_v62 = vadd.f32 %v584_v60, %v576_v56 }
 0x2db   : > { %587 = vst.msk [vmem:[#allocation2 + $0x8] sm:$0xff] %vm356_vm1, %v585_v61  ;;  %588 = vst.msk [vmem:[#allocation2 + $0x10] sm:$0xff] %vm356_vm1, %v586_v62 }
 0x2dc PF: > { %593 = vrot.lane.b32.xlu0 %v571_v58, %s1026_s16  ;;  %v589_v63 = vld [vmem:[%s1169_s23] sm:$0xff]  ;;  %s764_s28 = sshll.u32 %s1008_s29, 8  ;;  %s617_s21 = sshll.u32 %s1169_s23, 4  ;;  %v590_v2 = vld [vmem:[%s1169_s23 + $0x8] sm:$0xff]  ;;  %s1224_s21 = int_to_ptr.vmem [resolvable:$true] %s617_s21 }
 0x2dd   : > { %s1222_s11 = scalar_lea.hbm %s1287_s6, %s764_s28  ;;  %s1303_s12 = sand.u32 1, %s996_s27  }
 0x2de   : > { %s1230_s29 = scalar_lea.sflag [#allocation6], %s1303_s12  ;;  %s926_s14 = scalar_lea.vmem %s1224_s21, 256 }
 0x2df   : > { %p927_p7 = scmp.ne.s32.totalorder %s1224_s21, %s926_s14  ;;  %s1027_s17 = smov [#allocation5]  }
 0x2e0   : > { %595 = vrot.lane.b32.xlu0 %v576_v56, %s1026_s16  ;;  %s930_s18 = sshll.u32 %s1027_s17, 4  ;;  %s931_s18 = int_to_ptr.vmem [resolvable:$false] %s930_s18 }
 0x2e1   : > { %p928_p9 = pnand %p927_p7, %p1117_p8  ;;  %s932_s19 = scalar_lea.vmem %s931_s18, 512 }
 0x2e2   : > { %p933_p11 = scmp.lt.s32.totalorder %s1224_s21, %s931_s18  ;;  %p934_p12 = scmp.lt.s32.totalorder %s932_s19, %s926_s14 }
 0x2e3   : > { %p929_p10 = pneg %p928_p9 }
 0x2e4   : > { %p935_p13 = por %p934_p12, %p933_p11 }
 0x2e6   : > { %p936_p1 = pnand %p935_p13, %p929_p10 }
 0x34e   : > { %v594_v0 = vpop.permute.xlu0 %593 }
 0x34f   : > { %v599_v1 = vadd.f32 %v594_v0, %v589_v63 }
 0x351   : > { %601 = vst.msk [vmem:[%s1169_s23] sm:$0xff] %vm356_vm1, %v599_v1 }
 0x352   : > { %v596_v3 = vpop.permute.xlu0 %595 }
 0x353   : > { %v600_v4 = vadd.f32 %v596_v3, %v590_v2 }
 0x355   : > { %602 = vst.msk [vmem:[%s1169_s23 + $0x8] sm:$0xff] %vm356_vm1, %v600_v4 }
 0x356   : > { %939 = shalt.err (!%p936_p1)
}
 0x357   : > { %s940_s23 = scalar_lea.hbm %s1222_s11, 256  ;;  %s944_s9 = scalar_lea.hbm %s1287_s6, 512 }
 0x358   : > { %p941_p2 = scmp.ne.s32.totalorder %s1222_s11, %s940_s23  ;;  %p945_p5 = scmp.lt.s32.totalorder %s1222_s11, %s1287_s6 }
 0x359   : > { %p946_p6 = scmp.lt.s32.totalorder %s944_s9, %s940_s23 }
 0x35a   : > { %p942_p3 = pnand %p941_p2, %p1117_p8 }
 0x35b   : > { %p947_p7 = por %p946_p6, %p945_p5 }
 0x35c   : > { %p943_p4 = pneg %p942_p3 }
 0x35e   : > { %p948_p9 = pnand %p947_p7, %p943_p4 }
 0x360   : > { %951 = shalt.err (!%p948_p9)
}
 0x361   : > { %s1028_s15 = smov 128   ;;  %s1029_s16 = smov 8  }
 0x362   : > { %824 = dma.vmem_to_hbm [thread:$0]  (%p1117_p8), %s1224_s21, 256, %s1222_s11, %s1230_s29, %s1028_s15, %s1028_s15, %s1029_s16  }
 0x363 PF: > { %p830_p10 = scmp.ge.s32.totalorder %s1020_s8, 2  ;;  %s632_s20 = sand.u32 1, %s992_s26  }
 0x364   : > { %s633_s28 = scalar_lea.sflag [#allocation6], %s632_s20 }
 0x365   : > { %p827_p11 = pnand %p830_p10, %p1127_p0 }
 0x367   : > { %p828_p12 = pneg %p827_p11 }
 0x369   : > { %987 = dma.done.wait (%p828_p12), %s633_s28, 256  }
 0x36a   : > { %989 = vsyncadd (%p828_p12), %s633_s28, 4294967040  ;;  %s25_s8 = sadd.s32 1, %s1020_s8   ;;  %s1305_s22 = sld [smem:[#allocation9_spill]] }
 0x36b   : > { %p22_p13 = scmp.ge.s32.totalorder %s25_s8, 8   ;;  %s1306_s0 = sld [smem:[#allocation15_spill]] }
 0x36c   : > { %s1307_s28 = sld [smem:[#allocation10_spill]]  ;;  %s1311_s26 = smov %s996_s27 }
 0x36d   : > { %s1308_s29 = sld [smem:[#allocation11_spill]]  ;;  %24 = sbr.rel (!%p22_p13) target bundleno = 20 (0x14), region = 98 }
 0x36e   : > { %s1309_s30 = sld [smem:[#allocation12_spill]] }
 0x36f   : > { %s1310_s7 = sld [smem:[#allocation13_spill]] }
 0x370   : > { %s1312_s27 = smov %s1305_s22 }
 0x372   :  { %638 = vsyncpa [#allocation6], 1 }
 0x373   :  { %640 = vsyncpa [#allocation6 + $0x1], 1 }

</bundles_post_ra>
